<compile_context>
chip_gen: v5e
topology: v5e:2x2
jax: 0.10.0
libtpu: 0.0.40
codegen_flags: <defaults>
</compile_context>

<pallas_src>
import jax
import jax.numpy as jnp
from jax.experimental import pallas as pl
from jax.experimental.pallas import tpu as pltpu

_LANE = 128


# --------------------------------------------------------------------------------------
# Stage 1: encoder + latent-code fold, once per batch element (grid=(B,)).
#   c  = Linear2(maxpool(relu(Linear1(inputs))))
#   b0 = dwc^T @ c^T + db0^T                        -> (H, 1) bias column for the decoder
# Hoisted out of the decoder so the hot grid has no cross-step scratch dependency.
# --------------------------------------------------------------------------------------
def _encoder_fold_kernel(x_ref, ew1_ref, eb1_ref, ew2_ref, eb2_ref,
                         dwcT_ref, db0T_ref, b0_ref):
    f32 = jnp.float32
    x = x_ref[0]                                                          # (M, 3)
    h = jnp.maximum(
        jnp.dot(x, ew1_ref[...], preferred_element_type=f32) + eb1_ref[...], 0.0)
    pooled = jnp.max(h, axis=0, keepdims=True)                            # (1, H) max-pool
    c = jnp.dot(pooled, ew2_ref[...], preferred_element_type=f32) + eb2_ref[...]   # (1, C)
    # (H, C) * (1, C) broadcast-multiply + lane reduce == dwc^T @ c^T (no transpose).
    b0_ref[0] = (jnp.sum(dwcT_ref[...] * c, axis=1, keepdims=True)
                 + db0T_ref[...])                                         # (H, 1)


# --------------------------------------------------------------------------------------
# Stage 2 (hot loop): conditioned MLP decoder over a lane-dense point tile + decode_udf.
# Flattened "parallel" grid over (batch x N-tiles). Pipeline-invariant weights arrive as
# ONE packed slab w of shape (H+8, H+4):
#   w[0:H,  0:H ] = dw1^T    w[0:H,  H] = db1^T    w[0:H, H+1:H+4] = dwp^T
#   w[H:H+8,0:H ] = dw2^T(zero-padded to 8 rows)   w[H:H+8, H]     = db2^T(padded)
# --------------------------------------------------------------------------------------
def _decoder_udf_kernel(pT_ref, b0_ref, w_ref, udf_ref):
    f32 = jnp.float32
    H = b0_ref.shape[1]

    pT = pT_ref[0]                                                        # (3, TN)
    b0 = b0_ref[0]                                                        # (H, 1)
    w = w_ref[...]                                                        # (H+8, H+4)
    dw1T = w[0:H, 0:H]                                                    # (H, H)
    db1 = w[0:H, H:H + 1]                                                 # (H, 1)
    dwpT = w[0:H, H + 1:H + 4]                                            # (H, 3)
    dw2T = w[H:H + 8, 0:H]                                                # (8, H)
    db2 = w[H:H + 8, H:H + 1]                                             # (8, 1)

    # K = 3 contraction as three VPU rank-1 updates (MXU reserved for the H x H layer).
    h0 = (dwpT[:, 0:1] * pT[0:1, :]
          + dwpT[:, 1:2] * pT[1:2, :]
          + dwpT[:, 2:3] * pT[2:3, :]
          + b0)
    h0 = jnp.maximum(h0, 0.0)                                             # (H, TN)
    h1 = jnp.maximum(jnp.dot(dw1T, h0, preferred_element_type=f32) + db1, 0.0)
    predT = jnp.dot(dw2T, h1, preferred_element_type=f32) + db2           # (8, TN)

    # decode_udf: sqrt(sum((pred - p)^2)) over 3 sublane rows (VPU + EUP, no XLU reduce).
    d0 = predT[0:1, :] - pT[0:1, :]
    d1 = predT[1:2, :] - pT[1:2, :]
    d2 = predT[2:3, :] - pT[2:3, :]
    udf_ref[0] = jnp.sqrt(d0 * d0 + d1 * d1 + d2 * d2)                    # (1, TN) lane-dense


def occupancy_network_forward(p, p_surface, inputs, params, *, tile_n=1024):
    """Pallas forward: returns udf of shape (B, N), matching OccupancyNetwork.decode_udf."""
    # TODO(synk): p_surface mirrors forward(p, p_surface, inputs) but decode/decode_udf
    # only consume (points, encoding), so it is unused here, as in the reference module.
    del p_surface
    B, N, _ = p.shape
    M = inputs.shape[1]
    H = params["dw1"].shape[0]
    C = params["ew2"].shape[1]
    f32 = jnp.float32

    # --- N tile: sweepable (512..2048), rounded to 128 lanes, clamped to padded N ------
    tile_n = max(_LANE, ((int(tile_n) + _LANE - 1) // _LANE) * _LANE)
    n_ceil = ((N + _LANE - 1) // _LANE) * _LANE
    tn = min(tile_n, n_ceil)                  # e.g. N=200 -> one 256-wide tile per batch
    n_tiles = pl.cdiv(N, tn)
    N_pad = n_tiles * tn
    if N_pad != N:
        p = jnp.pad(p, ((0, 0), (0, N_pad - N), (0, 0)))   # padded points cropped below

    # ---------------- stage 1: encoder + fold (tiny, grid over B only) -----------------
    dwcT = params["dwc"].T                                  # (H, C)
    db0T = params["db0"].T                                  # (H, 1)
    b0 = pl.pallas_call(
        _encoder_fold_kernel,
        out_shape=jax.ShapeDtypeStruct((B, H, 1), f32),
        grid_spec=pltpu.PrefetchScalarGridSpec(
            num_scalar_prefetch=0,
            grid=(B,),
            in_specs=[
                pl.BlockSpec((1, M, 3), lambda b: (b, 0, 0)),
                pl.BlockSpec(params["ew1"].shape, lambda b: (0, 0)),
                pl.BlockSpec(params["eb1"].shape, lambda b: (0, 0)),
                pl.BlockSpec(params["ew2"].shape, lambda b: (0, 0)),
                pl.BlockSpec(params["eb2"].shape, lambda b: (0, 0)),
                pl.BlockSpec(dwcT.shape, lambda b: (0, 0)),
                pl.BlockSpec(db0T.shape, lambda b: (0, 0)),
            ],
            out_specs=pl.BlockSpec((1, H, 1), lambda b: (b, 0, 0)),
        ),
        compiler_params=pltpu.CompilerParams(
            dimension_semantics=("parallel",),
            vmem_limit_bytes=32 * 1024 * 1024,
        ),
    )(inputs, params["ew1"], params["eb1"], params["ew2"], params["eb2"], dwcT, db0T)

    # ---------------- stage 2: decoder + udf over flattened (B * n_tiles) grid ---------
    pT = jnp.transpose(p, (0, 2, 1))                        # (B, 3, N_pad): points on lanes

    # One packed weight slab: single prologue DMA / single double-buffered operand.
    dw2T_pad = jnp.pad(params["dw2"].T, ((0, 5), (0, 0)))   # (8, H): rows 3..7 zero pad
    db2T_pad = jnp.pad(params["db2"].T, ((0, 5), (0, 0)))   # (8, 1)
    w_top = jnp.concatenate(
        [params["dw1"].T, params["db1"].T, params["dwp"].T], axis=1)       # (H, H+4)
    w_bot = jnp.concatenate(
        [dw2T_pad, db2T_pad, jnp.zeros((8, 3), f32)], axis=1)              # (8, H+4)
    w_slab = jnp.concatenate([w_top, w_bot], axis=0)                       # (H+8, H+4)

    # Corrected (decoder-only) advisory cost estimate.
    flops = B * N_pad * (2 * 3 * H + 2 * H * H + 2 * 8 * H + 9)
    bytes_accessed = 4 * (B * 3 * N_pad + B * N_pad + B * H + int(w_slab.size))

    out = pl.pallas_call(
        _decoder_udf_kernel,
        out_shape=jax.ShapeDtypeStruct((B, 1, N_pad), f32),
        grid_spec=pltpu.PrefetchScalarGridSpec(
            num_scalar_prefetch=0,
            grid=(B * n_tiles,),
            in_specs=[
                pl.BlockSpec((1, 3, tn), lambda t: (t // n_tiles, 0, t % n_tiles)),
                pl.BlockSpec((1, H, 1), lambda t: (t // n_tiles, 0, 0)),
                # TODO(synk): pipeline_mode=pl.Buffered(1) would also drop the
                # double-buffering of this pipeline-invariant slab; omitted for safety.
                pl.BlockSpec(w_slab.shape, lambda t: (0, 0)),
            ],
            out_specs=pl.BlockSpec((1, 1, tn), lambda t: (t // n_tiles, 0, t % n_tiles)),
        ),
        compiler_params=pltpu.CompilerParams(
            # Single flattened parallel axis: no cross-step dependency left, so v7x's
            # two TensorCores split the whole (batch x tile) space; no-op on v5e/v6e.
            dimension_semantics=("parallel",),
            # 32 MiB scoped VMEM: double-buffer headroom on v5e/v6e and inside v7x's
            # 64 MiB physical VMEM (do not raise toward 128 MiB when tuning on v6e).
            vmem_limit_bytes=32 * 1024 * 1024,
        ),
        cost_estimate=pl.CostEstimate(
            flops=flops, transcendentals=B * N_pad, bytes_accessed=bytes_accessed),
    )(pT, b0, w_slab)

    return out[:, 0, :N]                                     # (B, N): free squeeze + crop


def init_params(key, hidden=32, c_dim=16):
    """Torch nn.Linear convention: W is (in_features, out_features), x @ W + b."""
    ks = jax.random.split(key, 7)
    s = 0.1
    return {
        # encoder
        "ew1": s * jax.random.normal(ks[0], (3, hidden), jnp.float32),
        "eb1": jnp.zeros((1, hidden), jnp.float32),
        "ew2": s * jax.random.normal(ks[1], (hidden, c_dim), jnp.float32),
        "eb2": jnp.zeros((1, c_dim), jnp.float32),
        # decoder (first layer split into point-part and code-part == concat([p, c]) @ W0)
        "dwp": s * jax.random.normal(ks[2], (3, hidden), jnp.float32),
        "dwc": s * jax.random.normal(ks[3], (c_dim, hidden), jnp.float32),
        "db0": jnp.zeros((1, hidden), jnp.float32),
        "dw1": s * jax.random.normal(ks[4], (hidden, hidden), jnp.float32),
        "db1": jnp.zeros((1, hidden), jnp.float32),
        "dw2": s * jax.random.normal(ks[5], (hidden, 3), jnp.float32),
        "db2": jnp.zeros((1, 3), jnp.float32),
    }


def ref_forward(p, inputs, params):
    """Pure-JAX reference of the same forward, for a correctness check."""
    h = jnp.maximum(inputs @ params["ew1"] + params["eb1"], 0.0)          # (B,M,H)
    c = jnp.max(h, axis=1) @ params["ew2"] + params["eb2"]                # (B,C)
    h0 = jnp.maximum(p @ params["dwp"] + (c @ params["dwc"])[:, None, :]
                     + params["db0"], 0.0)                                # (B,N,H)
    h1 = jnp.maximum(h0 @ params["dw1"] + params["db1"], 0.0)
    pred = h1 @ params["dw2"] + params["db2"]                             # (B,N,3)
    return jnp.sqrt(jnp.sum((pred - p) ** 2, axis=-1))                    # (B,N)


if __name__ == "__main__":
    key = jax.random.PRNGKey(0)
    k_p, k_ps, k_in, k_w = jax.random.split(key, 4)

    # small shapes: batch=2, 200 query points (exercises the ragged N-tile clamp/pad path),
    # 16 conditioning points, hidden=32, c_dim=16
    B, N, M = 2, 200, 16
    p = jax.random.uniform(k_p, (B, N, 3), jnp.float32, -0.5, 0.5)
    p_surface = jax.random.uniform(k_ps, (B, N, 3), jnp.float32, -0.5, 0.5)
    inputs = jax.random.uniform(k_in, (B, M, 3), jnp.float32, -0.5, 0.5)

    params = init_params(k_w, hidden=32, c_dim=16)

    udf = occupancy_network_forward(p, p_surface, inputs, params, tile_n=1024)
    udf = jax.block_until_ready(udf)

    udf_ref = ref_forward(p, inputs, params)
    assert udf.shape == (B, N)
    assert jnp.allclose(udf, udf_ref, atol=1e-4, rtol=1e-4), "mismatch vs JAX reference"

    print("KERNEL_OK")
</pallas_src>

<mosaic_0001>
module attributes {stable_mosaic.version = 11 : i64} {
  func.func @_encoder_fold_kernel(%arg0: i32, %arg1: memref<1x16x3xf32, #tpu.memory_space<vmem>>, %arg2: memref<3x32xf32, #tpu.memory_space<vmem>>, %arg3: memref<1x32xf32, #tpu.memory_space<vmem>>, %arg4: memref<32x16xf32, #tpu.memory_space<vmem>>, %arg5: memref<1x16xf32, #tpu.memory_space<vmem>>, %arg6: memref<32x16xf32, #tpu.memory_space<vmem>>, %arg7: memref<32x1xf32, #tpu.memory_space<vmem>>, %arg8: memref<1x32x1xf32, #tpu.memory_space<vmem>>) attributes {dimension_semantics = [#tpu.dimension_semantics<parallel>], iteration_bounds = array<i64: 2>, scalar_prefetch = 0 : i64, scratch_operands = 0 : i64, tpu.core_type = #tpu.core_type<tc>, window_params = [{transform_indices = @transform_0, window_bounds = array<i64: 1, 16, 3>}, {pipeline_mode = #tpu.pipeline_mode<synchronous>, transform_indices = @transform_1, window_bounds = array<i64: 3, 32>}, {pipeline_mode = #tpu.pipeline_mode<synchronous>, transform_indices = @transform_2, window_bounds = array<i64: 1, 32>}, {pipeline_mode = #tpu.pipeline_mode<synchronous>, transform_indices = @transform_3, window_bounds = array<i64: 32, 16>}, {pipeline_mode = #tpu.pipeline_mode<synchronous>, transform_indices = @transform_4, window_bounds = array<i64: 1, 16>}, {pipeline_mode = #tpu.pipeline_mode<synchronous>, transform_indices = @transform_5, window_bounds = array<i64: 32, 16>}, {pipeline_mode = #tpu.pipeline_mode<synchronous>, transform_indices = @transform_6, window_bounds = array<i64: 32, 1>}, {transform_indices = @transform_7, window_bounds = array<i64: 1, 32, 1>}]} {
    %c0 = arith.constant 0 : index
    %c0_0 = arith.constant 0 : index
    %c0_1 = arith.constant 0 : index
    %0 = vector.load %arg1[%c0, %c0_0, %c0_1] : memref<1x16x3xf32, #tpu.memory_space<vmem>>, vector<1x16x3xf32>
    %1 = vector.shape_cast %0 : vector<1x16x3xf32> to vector<16x3xf32>
    %c0_2 = arith.constant 0 : index
    %c0_3 = arith.constant 0 : index
    %2 = vector.load %arg2[%c0_2, %c0_3] : memref<3x32xf32, #tpu.memory_space<vmem>>, vector<3x32xf32>
    %cst = arith.constant dense<0.000000e+00> : vector<16x32xf32>
    %3 = tpu.matmul %1, %2, %cst {dimension_numbers = #tpu.dot_dimension_numbers<[1], [0], [0], [1], [0, 0, 1, 1], [], []>} : vector<16x3xf32>, vector<3x32xf32>, vector<16x32xf32> -> vector<16x32xf32>
    %c0_4 = arith.constant 0 : index
    %c0_5 = arith.constant 0 : index
    %4 = vector.load %arg3[%c0_4, %c0_5] : memref<1x32xf32, #tpu.memory_space<vmem>>, vector<1x32xf32>
    %5 = vector.broadcast %4 : vector<1x32xf32> to vector<16x32xf32>
    %6 = arith.addf %3, %5 : vector<16x32xf32>
    %cst_6 = arith.constant 0.000000e+00 : f32
    %7 = vector.broadcast %cst_6 : f32 to vector<16x32xf32>
    %8 = arith.maximumf %6, %7 : vector<16x32xf32>
    %cst_7 = arith.constant dense<0xFF800000> : vector<32xf32>
    %9 = vector.multi_reduction <maximumf>, %8, %cst_7 [0] : vector<16x32xf32> to vector<32xf32>
    %10 = vector.shape_cast %9 : vector<32xf32> to vector<1x32xf32>
    %c0_8 = arith.constant 0 : index
    %c0_9 = arith.constant 0 : index
    %11 = vector.load %arg4[%c0_8, %c0_9] : memref<32x16xf32, #tpu.memory_space<vmem>>, vector<32x16xf32>
    %cst_10 = arith.constant dense<0.000000e+00> : vector<1x16xf32>
    %12 = tpu.matmul %10, %11, %cst_10 {dimension_numbers = #tpu.dot_dimension_numbers<[1], [0], [0], [1], [0, 0, 1, 1], [], []>} : vector<1x32xf32>, vector<32x16xf32>, vector<1x16xf32> -> vector<1x16xf32>
    %c0_11 = arith.constant 0 : index
    %c0_12 = arith.constant 0 : index
    %13 = vector.load %arg5[%c0_11, %c0_12] : memref<1x16xf32, #tpu.memory_space<vmem>>, vector<1x16xf32>
    %14 = arith.addf %12, %13 : vector<1x16xf32>
    %c0_13 = arith.constant 0 : index
    %c0_14 = arith.constant 0 : index
    %15 = vector.load %arg6[%c0_13, %c0_14] : memref<32x16xf32, #tpu.memory_space<vmem>>, vector<32x16xf32>
    %16 = vector.broadcast %14 : vector<1x16xf32> to vector<32x16xf32>
    %17 = arith.mulf %15, %16 : vector<32x16xf32>
    %cst_15 = arith.constant dense<0.000000e+00> : vector<32xf32>
    %18 = vector.multi_reduction <add>, %17, %cst_15 [1] : vector<32x16xf32> to vector<32xf32>
    %19 = vector.shape_cast %18 : vector<32xf32> to vector<32x1xf32>
    %c0_16 = arith.constant 0 : index
    %c0_17 = arith.constant 0 : index
    %20 = vector.load %arg7[%c0_16, %c0_17] : memref<32x1xf32, #tpu.memory_space<vmem>>, vector<32x1xf32>
    %21 = arith.addf %19, %20 : vector<32x1xf32>
    %c0_18 = arith.constant 0 : index
    %c0_19 = arith.constant 0 : index
    %c0_20 = arith.constant 0 : index
    %22 = vector.load %arg8[%c0_18, %c0_19, %c0_20] : memref<1x32x1xf32, #tpu.memory_space<vmem>>, vector<1x32x1xf32>
    %23 = vector.shape_cast %22 : vector<1x32x1xf32> to vector<32x1xf32>
    %24 = vector.shape_cast %21 : vector<32x1xf32> to vector<1x32x1xf32>
    tpu.vector_store %arg8[%c0_18, %c0_19, %c0_20], %24 {strides = array<i32>} : memref<1x32x1xf32, #tpu.memory_space<vmem>>, vector<1x32x1xf32>,
    return
  }
  func.func @transform_0(%arg0: i32) -> (i32, i32, i32) {
    %c0_i32 = arith.constant 0 : i32
    %c0_i32_0 = arith.constant 0 : i32
    %c0_i32_1 = arith.constant 0 : i32
    return %arg0, %c0_i32, %c0_i32_0 : i32, i32, i32
  }
  func.func @transform_1(%arg0: i32) -> (i32, i32) {
    %c0_i32 = arith.constant 0 : i32
    %c0_i32_0 = arith.constant 0 : i32
    %c0_i32_1 = arith.constant 0 : i32
    return %c0_i32, %c0_i32_0 : i32, i32
  }
  func.func @transform_2(%arg0: i32) -> (i32, i32) {
    %c0_i32 = arith.constant 0 : i32
    %c0_i32_0 = arith.constant 0 : i32
    %c0_i32_1 = arith.constant 0 : i32
    return %c0_i32, %c0_i32_0 : i32, i32
  }
  func.func @transform_3(%arg0: i32) -> (i32, i32) {
    %c0_i32 = arith.constant 0 : i32
    %c0_i32_0 = arith.constant 0 : i32
    %c0_i32_1 = arith.constant 0 : i32
    return %c0_i32, %c0_i32_0 : i32, i32
  }
  func.func @transform_4(%arg0: i32) -> (i32, i32) {
    %c0_i32 = arith.constant 0 : i32
    %c0_i32_0 = arith.constant 0 : i32
    %c0_i32_1 = arith.constant 0 : i32
    return %c0_i32, %c0_i32_0 : i32, i32
  }
  func.func @transform_5(%arg0: i32) -> (i32, i32) {
    %c0_i32 = arith.constant 0 : i32
    %c0_i32_0 = arith.constant 0 : i32
    %c0_i32_1 = arith.constant 0 : i32
    return %c0_i32, %c0_i32_0 : i32, i32
  }
  func.func @transform_6(%arg0: i32) -> (i32, i32) {
    %c0_i32 = arith.constant 0 : i32
    %c0_i32_0 = arith.constant 0 : i32
    %c0_i32_1 = arith.constant 0 : i32
    return %c0_i32, %c0_i32_0 : i32, i32
  }
  func.func @transform_7(%arg0: i32) -> (i32, i32, i32) {
    %c0_i32 = arith.constant 0 : i32
    %c0_i32_0 = arith.constant 0 : i32
    %c0_i32_1 = arith.constant 0 : i32
    return %arg0, %c0_i32, %c0_i32_0 : i32, i32, i32
  }
}

</mosaic_0001>

<bundles_post_ra>
// kernel: tpu_custom_call.1
= control target key start
LH: loop header
LB: loop body
LE: loop exit
PB: predicated region body
PF: predicated region fallthrough
CT: control target
= control target key end

     0   :  { %s525_s24 = smov 0   ;;  %s591_s0 = inlined_call_operand.vmem [shape: f32[2,16,3], index: 0, kind: input, shape index: {}]   ;;  %s592_s1 = inlined_call_operand.vmem [shape: f32[3,32], index: 1, kind: input, shape index: {}]   ;;  %s593_s2 = inlined_call_operand.vmem [shape: f32[1,32], index: 2, kind: input, shape index: {}]   ;;  %s594_s3 = inlined_call_operand.vmem [shape: f32[32,16], index: 3, kind: input, shape index: {}]   ;;  %s595_s4 = inlined_call_operand.vmem [shape: f32[1,16], index: 4, kind: input, shape index: {}]   ;;  %s596_s5 = inlined_call_operand.vmem [shape: f32[32,16], index: 5, kind: input, shape index: {}]   ;;  %s597_s6 = inlined_call_operand.vmem [shape: f32[32,1], index: 6, kind: input, shape index: {}]   ;;  %s598_s7 = inlined_call_operand.vmem [shape: f32[2,32,1], index: 7, kind: output, shape index: {}]  }
   0x1 LB: > { %s450_s25 = sadd.s32 4294967295, %s483_s24   ;;  %p454_p0 = scmp.ge.s32.totalorder %s483_s24, 1  ;;  %s483_s24 = sphi %s525_s24, %s17_s24  }
   0x2   : > { %p237_p1 = scmp.lt.s32.totalorder %s483_s24, 3 }
   0x4   : > { %p238_p2 = pnand %p454_p0, %p237_p1 }
   0x5   : > { %p269_p3 = scmp.lt.s32.totalorder (!%p238_p2), %s450_s25, 1 }
   0x6   : > { %241 = sbr.rel (%p238_p2) target bundleno = 427 (0x1ab), region = 48 }
   0xb   : > { %v281_v0 = vld [vmem:[%s592_s1] sm:$0x7]  ;;  %vm293_vm0 = vcmask 1042432   ;;  %s600_s25 = smov (!%p269_p3, %s450_s25), 1  ;;  %vm286_vm1 = vcmask 23552   ;;  %v335_v3 = vld [vmem:[%s594_s3 + $0x18] sm:$0xff] }
   0xc   : > { %467 = vmatpush.msk.msra.mxu2 %vm293_vm0, %v281_v0  ;;  %459 = vmatpush.msk.msra.mxu0 %vm293_vm0, %v281_v0  ;;  %s465_s28 = sshll.u32 %s600_s25, 4  ;;  %v334_v4 = vld [vmem:[%s594_s3 + $0x10] sm:$0xff]  ;;  %v333_v5 = vld [vmem:[%s594_s3 + $0x8] sm:$0xff]  ;;  %v332_v6 = vld [vmem:[%s594_s3] sm:$0xff]  ;;  %vm322_vm2 = vcmask 261120   ;;  %vm369_vm3 = vcmask 130048  }
   0xd   : > { %s273_s8 = scalar_lea.vmem %s591_s0, %s465_s28  ;;  %352 = vmatpush.msra.mxu1 %v335_v3  ;;  %v476_v7 = vld [vmem:[%s593_s2] ss:$0 sm:$0xff]  ;;  %v362_v26 = vld [vmem:[%s596_s5 + $0x10] sm:$0xff]  ;;  %v363_v33 = vld [vmem:[%s596_s5 + $0x18] sm:$0xff]  ;;  %vm390_vm4 = vcmask 7168  }
   0xe   : > { %v280_v1 = vld [vmem:[%s273_s8 + $0x8] sm:$0xff]  ;;  %v279_v2 = vld [vmem:[%s273_s8] sm:$0xff]  ;;  %s466_s8 = sshll.u32 %s600_s25, 5  ;;  %v384_v39 = vld [vmem:[%s597_s6 + $0x10] sm:$0xff] }
   0xf   : > { %461 = vmatmul.msk.f32.vlgmr.msra.gmra.mxu2 %vm286_vm1, %v280_v1  ;;  %460 = vmatmul.msk.f32.vlgmr.msra.gmra.mxu0 %vm286_vm1, %v279_v2  ;;  %v336_v23 = vld [vmem:[%s595_s4] sm:$0x1]  ;;  %v361_v34 = vld [vmem:[%s596_s5 + $0x8] sm:$0xff]  ;;  %s278_s15 = scalar_lea.vmem %s598_s7, %s466_s8  ;;  %v385_v45 = vld [vmem:[%s597_s6 + $0x18] sm:$0xff] }
  0x10   : > { %353 = vmatpush.msra.mxu1 %v334_v4  ;;  %v360_v27 = vld [vmem:[%s596_s5] sm:$0xff]  ;;  %v383_v46 = vld [vmem:[%s597_s6 + $0x8] sm:$0xff] }
  0x11   : > { %v382_v40 = vld [vmem:[%s597_s6] sm:$0xff] }
  0x12   : > { %354 = vmatpush.msra.mxu1 %v333_v5 }
  0x14   : > { %355 = vmatpush.msra.mxu1 %v332_v6 }
  0x8c   : > { %v314_v8 = vpop.f32.mrf.mxu0 }
  0x8d   : > { %v315_v9 = vadd.f32 %v476_v7, %v314_v8 }
  0x8f   : > { %v320_v10 = vmax.f32 %v315_v9, 0.0 }
  0x91   : > { %v323_v14 = vsel %vm322_vm2, %v320_v10, -inf }
  0x92   : > { %v317_v11 = vpop.f32.mrf.mxu2 }
  0x93   : > { %v318_v12 = vadd.f32 %v476_v7, %v317_v11 }
  0x95   : > { %v321_v13 = vmax.f32 %v318_v12, 0.0 }
  0x97   : > { %v324_v15 = vsel %vm322_vm2, %v321_v13, -inf }
  0x98   : > { %v325_v16 = vmax.f32 %v323_v14, %v324_v15 }
  0x9a   : > { %v326_v17 = vrot.slane %v325_v16, 4 }
  0x9c   : > { %v327_v18 = vmax.f32 %v325_v16, %v326_v17 }
  0x9e   : > { %v328_v19 = vrot.slane %v327_v18, 2 }
  0xa0   : > { %v329_v20 = vmax.f32 %v327_v18, %v328_v19 }
  0xa2   : > { %v330_v21 = vrot.slane %v329_v20, 1 }
  0xa4   : > { %v331_v22 = vmax.f32 %v329_v20, %v330_v21 }
  0xa6   : > { %462 = vmatmul.msk.f32.vlgmr.msra.gmra.mxu1 %vm322_vm2, %v331_v22 }
 0x123   : > { %v357_v24 = vpop.f32.mrf.mxu1 }
 0x124   : > { %v358_v25 = vadd.f32 %v357_v24, %v336_v23 }
 0x126   : > { %v364_v28 = vperm.slane %v358_v25, 0 }
 0x128   : > { %v367_v29 = vmul.f32 %v364_v28, %v362_v26  ;;  %v365_v30 = vmul.f32 %v364_v28, %v360_v27  ;;  %v368_v35 = vmul.f32 %v364_v28, %v363_v33  ;;  %v366_v36 = vmul.f32 %v364_v28, %v361_v34 }
 0x12a   : > { %v376_v31 = vsel %vm369_vm3, %v367_v29, 0.0  ;;  %v370_v32 = vsel %vm369_vm3, %v365_v30, 0.0  ;;  %v379_v37 = vsel %vm369_vm3, %v368_v35, 0.0  ;;  %v373_v38 = vsel %vm369_vm3, %v366_v36, 0.0 }
 0x12b   : > { %377 = vadd.xlane.f32.xlu1 %v376_v31  ;;  %371 = vadd.xlane.f32.xlu0 %v370_v32 }
 0x133   : > { %380 = vadd.xlane.f32.xlu1 %v379_v37  ;;  %374 = vadd.xlane.f32.xlu0 %v373_v38 }
 0x19e   : > { %v378_v41 = vpop.xlane.xlu1 %377  ;;  %v372_v42 = vpop.xlane.xlu0 %371 }
 0x19f   : > { %v388_v43 = vadd.f32 %v384_v39, %v378_v41  ;;  %v386_v44 = vadd.f32 %v382_v40, %v372_v42 }
 0x1a1   : > { %393 = vst.msk [vmem:[%s278_s15 + $0x10] sm:$0xff] %vm390_vm4, %v388_v43 }
 0x1a2   : > { %391 = vst.msk [vmem:[%s278_s15] sm:$0xff] %vm390_vm4, %v386_v44 }
 0x1a6   : > { %v381_v47 = vpop.xlane.xlu1 %380  ;;  %v375_v48 = vpop.xlane.xlu0 %374 }
 0x1a7   : > { %v389_v49 = vadd.f32 %v385_v45, %v381_v47  ;;  %v387_v50 = vadd.f32 %v383_v46, %v375_v48 }
 0x1a9   : > { %394 = vst.msk [vmem:[%s278_s15 + $0x18] sm:$0xff] %vm390_vm4, %v389_v49 }
 0x1aa   : > { %392 = vst.msk [vmem:[%s278_s15 + $0x8] sm:$0xff] %vm390_vm4, %v387_v50 }
 0x1ab PF: > { %s17_s24 = sadd.s32 1, %s483_s24  }
 0x1ac   : > { %p14_p4 = scmp.ge.s32.totalorder %s17_s24, 4  }
 0x1ae   :  { %16 = sbr.rel (!%p14_p4) target bundleno = 1 (0x1), region = 78 }

</bundles_post_ra>
